<compile_context>
chip_gen: v6e
topology: v6e:2x2x1
jax: 0.10.0
libtpu: 0.0.40
codegen_flags: <defaults>
</compile_context>

<pallas_src>
import math
import jax
import jax.numpy as jnp
from jax.experimental import pallas as pl
from jax.experimental.pallas import tpu as pltpu


def _kv_proj_kernel(head_count, dim_per_head):
    def kernel(k_ref, v_ref, wk_ref, wvT_ref, kT_ref, vh_ref):
        k_len = k_ref.shape[1]
        # K^T per head is computed directly as W_k @ K^T (contract feature dims),
        # so the (heads, dim_per_head, k_len) store is a free leading-axis reshape
        # — no XLU relayout of a (k_len, d) tile.
        kT = jnp.einsum("of,kf->ok", wk_ref[...], k_ref[0],
                        preferred_element_type=jnp.float32)
        kT_ref[0] = kT.reshape(head_count, dim_per_head, k_len).astype(kT_ref.dtype)
        # V projection, then a single once-per-batch head-major relayout.
        vp = jnp.dot(v_ref[0], wvT_ref[...], preferred_element_type=jnp.float32)
        vh_ref[0] = (vp.reshape(k_len, head_count, dim_per_head)
                     .transpose(1, 0, 2).astype(vh_ref.dtype))
    return kernel


def _attn_kernel(head_count, dim_per_head):
    scale = 1.0 / math.sqrt(dim_per_head)

    def kernel(q_ref, wqT_ref, kT_ref, vh_ref, out_ref, attn_ref):
        tq = q_ref.shape[1]
        d = head_count * dim_per_head

        # Q projection (Linear, bias=False, weight pre-transposed at trace time).
        # The 1/sqrt(dph) scale is folded here (tq*d multiplies) instead of
        # scaling the (heads, tq, k_len) score tensor.
        q = jnp.dot(q_ref[0], wqT_ref[...],
                    preferred_element_type=jnp.float32) * scale
        qh = (q.reshape(tq, head_count, dim_per_head)
              .transpose(1, 0, 2).astype(kT_ref.dtype))

        # Scores: cached K^T is already head-major with k_len on the lane axis,
        # so this is a dense batched MXU matmul with no per-step relayout.
        s = jnp.einsum("hqd,hdk->hqk", qh, kT_ref[0],
                       preferred_element_type=jnp.float32)

        # Numerically-stable softmax over keys. Exact reciprocal because the
        # probabilities are exported to the caller as top_attn.
        s = s - jnp.max(s, axis=-1, keepdims=True)
        e = jnp.exp(s)
        p = e * pl.reciprocal(jnp.sum(e, axis=-1, keepdims=True), approx=False)

        ctx = jnp.einsum("hqk,hkd->hqd", p.astype(vh_ref.dtype), vh_ref[0],
                         preferred_element_type=jnp.float32)

        # One lane-dense (tq, d) store instead of per-head column stripes.
        out_ref[0] = ctx.transpose(1, 0, 2).reshape(tq, d).astype(out_ref.dtype)
        # top_attn: head-0 post-softmax probabilities (pre-dropout).
        attn_ref[0] = p[0].astype(attn_ref.dtype)

        # TODO(synk): boolean attention mask not implemented (mask=None path only).
        # TODO(synk): dropout / res_dropout are identity (eval-mode semantics).
        # TODO(synk): for very long k_len, tile the key axis (flash-style online
        # softmax) instead of materializing the full (heads, tq, k_len) scores.
    return kernel


def _choose_q_tile(q_len, k_len, head_count, sublane, max_q_tile, budget_bytes):
    """Largest sublane-aligned divisor of q_len whose f32 softmax intermediates
    (scores / exp / probs ~ 3x (heads, tq, k_len) plus the double-buffered
    (tq, k_len) attn output block) fit the VMEM budget."""
    per_row = (3 * head_count + 2) * k_len * 4
    cap = max(sublane, budget_bytes // max(per_row, 1))
    if max_q_tile is not None:
        cap = min(cap, max_q_tile)
    best = None
    t = sublane
    while t <= q_len:
        if q_len % t == 0 and t <= cap:
            best = t
        t += sublane
    if best is None:
        # No sublane-aligned divisor fits: a block equal to the full q axis is
        # always a legal block shape.
        best = q_len
    return best


def multi_headed_attention(key, value, query, wk, wv, wq, head_count, *,
                           compute_dtype=jnp.bfloat16,
                           attn_dtype=jnp.float32,
                           max_q_tile=None,
                           softmax_vmem_budget=24 * 1024 * 1024):
    """Pallas forward of MultiHeadedAttention (eval mode, mask=None).

    key/value: [batch, k_len, d], query: [batch, q_len, d]
    wk/wv/wq:  [d, d]  (PyTorch Linear layout: out x in, bias=False)
    Returns (context [batch, q_len, d] in the query dtype,
             top_attn [batch, q_len, k_len] in attn_dtype).
    """
    batch, k_len, d = key.shape
    _, q_len, _ = query.shape
    assert d % head_count == 0
    dim_per_head = d // head_count

    cd = jnp.dtype(compute_dtype)
    sublane = 8 if cd.itemsize >= 4 else 16          # bf16 packs 16 rows / sublane tile
    tq = _choose_q_tile(q_len, k_len, head_count, sublane, max_q_tile,
                        softmax_vmem_budget)
    n_qt = q_len // tq

    # bf16 activations / weights for the MXU matmuls (f32 accumulation in-kernel).
    key_c = key.astype(cd)
    value_c = value.astype(cd)
    query_c = query.astype(cd)
    wk_c = wk.astype(cd)         # used UNtransposed: kT = W_k @ key^T
    wvT_c = wv.T.astype(cd)      # transposed once at trace time
    wqT_c = wq.T.astype(cd)

    # ---- prologue: K/V projections, once per batch element, head-major --------
    kT, vh = pl.pallas_call(
        _kv_proj_kernel(head_count, dim_per_head),
        out_shape=(
            jax.ShapeDtypeStruct((batch, head_count, dim_per_head, k_len), cd),
            jax.ShapeDtypeStruct((batch, head_count, k_len, dim_per_head), cd),
        ),
        grid=(batch,),
        in_specs=[
            pl.BlockSpec((1, k_len, d), lambda b: (b, 0, 0)),
            pl.BlockSpec((1, k_len, d), lambda b: (b, 0, 0)),
            pl.BlockSpec((d, d), lambda b: (0, 0)),
            pl.BlockSpec((d, d), lambda b: (0, 0)),
        ],
        out_specs=(
            pl.BlockSpec((1, head_count, dim_per_head, k_len),
                         lambda b: (b, 0, 0, 0)),
            pl.BlockSpec((1, head_count, k_len, dim_per_head),
                         lambda b: (b, 0, 0, 0)),
        ),
        compiler_params=pltpu.CompilerParams(
            dimension_semantics=("parallel",),
            vmem_limit_bytes=48 * 1024 * 1024,
        ),
    )(key_c, value_c, wk_c, wvT_c)

    # ---- attention: grid (batch, q_tiles); no cross-step scratch -> both axes
    # parallel (v7x megacore).  kT / vh blocks are indexed only by b, so they are
    # fetched once per batch element and reused across q-tiles by the pipeline.
    out, top_attn = pl.pallas_call(
        _attn_kernel(head_count, dim_per_head),
        out_shape=(
            jax.ShapeDtypeStruct((batch, q_len, d), query.dtype),
            jax.ShapeDtypeStruct((batch, q_len, k_len), attn_dtype),
        ),
        grid=(batch, n_qt),
        in_specs=[
            pl.BlockSpec((1, tq, d), lambda b, qi: (b, qi, 0)),
            pl.BlockSpec((d, d), lambda b, qi: (0, 0)),
            pl.BlockSpec((1, head_count, dim_per_head, k_len),
                         lambda b, qi: (b, 0, 0, 0)),
            pl.BlockSpec((1, head_count, k_len, dim_per_head),
                         lambda b, qi: (b, 0, 0, 0)),
        ],
        out_specs=(
            pl.BlockSpec((1, tq, d), lambda b, qi: (b, qi, 0)),
            pl.BlockSpec((1, tq, k_len), lambda b, qi: (b, qi, 0)),
        ),
        compiler_params=pltpu.CompilerParams(
            dimension_semantics=("parallel", "parallel"),
            vmem_limit_bytes=48 * 1024 * 1024,
        ),
    )(query_c, wqT_c, kT, vh)

    return out, top_attn


def _reference(key, value, query, wk, wv, wq, head_count):
    """Pure-JAX f32 reference mirroring the PyTorch forward (eval, mask=None)."""
    b, k_len, d = key.shape
    _, q_len, _ = query.shape
    dph = d // head_count

    def split_heads(x):
        L = x.shape[1]
        return x.reshape(b, L, head_count, dph).transpose(0, 2, 1, 3)

    K = split_heads(key @ wk.T)
    V = split_heads(value @ wv.T)
    Q = split_heads(query @ wq.T)
    scores = jnp.einsum("bhqd,bhkd->bhqk", Q, K) / math.sqrt(dph)
    attn = jax.nn.softmax(scores, axis=-1)
    ctx = jnp.einsum("bhqk,bhkd->bhqd", attn, V)
    out = ctx.transpose(0, 2, 1, 3).reshape(b, q_len, d)
    return out, attn[:, 0]


def _run_case(batch, q_len, k_len, model_dim, head_count, seed, max_q_tile):
    root = jax.random.PRNGKey(seed)
    kk, kv_, kq, kwk, kwv, kwq = jax.random.split(root, 6)

    key = jax.random.normal(kk, (batch, k_len, model_dim), jnp.float32)
    value = jax.random.normal(kv_, (batch, k_len, model_dim), jnp.float32)
    query = jax.random.normal(kq, (batch, q_len, model_dim), jnp.float32)

    winit = 1.0 / math.sqrt(model_dim)
    wk = jax.random.uniform(kwk, (model_dim, model_dim), jnp.float32, -winit, winit)
    wv = jax.random.uniform(kwv, (model_dim, model_dim), jnp.float32, -winit, winit)
    wq = jax.random.uniform(kwq, (model_dim, model_dim), jnp.float32, -winit, winit)

    out, top_attn = multi_headed_attention(key, value, query, wk, wv, wq,
                                           head_count, max_q_tile=max_q_tile)
    out = jax.block_until_ready(out)
    top_attn = jax.block_until_ready(top_attn)

    ref_out, ref_attn = _reference(key, value, query, wk, wv, wq, head_count)
    assert out.shape == (batch, q_len, model_dim)
    assert top_attn.shape == (batch, q_len, k_len)
    # Matmuls run with bf16 inputs (f32 accumulation) -> modest tolerance vs the
    # f32 reference.  Softmax itself uses an exact reciprocal.
    assert jnp.allclose(out, ref_out, atol=3e-2, rtol=3e-2), \
        float(jnp.max(jnp.abs(out - ref_out)))
    assert jnp.allclose(top_attn, ref_attn, atol=2e-2, rtol=2e-2), \
        float(jnp.max(jnp.abs(top_attn - ref_attn)))


if __name__ == "__main__":
    # Case 1: self-attention, single q-tile.  batch=2, seq=8, model_dim=32, heads=4.
    _run_case(batch=2, q_len=8, k_len=8, model_dim=32, head_count=4,
              seed=0, max_q_tile=None)
    # Case 2: cross-attention with two q-tiles (exercises the q-tile grid axis and
    # the head-major K/V blocks cached/reused across q-tiles).
    _run_case(batch=2, q_len=32, k_len=16, model_dim=64, head_count=8,
              seed=1, max_q_tile=16)

    print("KERNEL_OK")
</pallas_src>

<mosaic_0001>
module attributes {stable_mosaic.version = 11 : i64} {
  func.func @kernel(%arg0: i32, %arg1: memref<1x8x32xbf16, #tpu.memory_space<vmem>>, %arg2: memref<1x8x32xbf16, #tpu.memory_space<vmem>>, %arg3: memref<32x32xbf16, #tpu.memory_space<vmem>>, %arg4: memref<32x32xbf16, #tpu.memory_space<vmem>>, %arg5: memref<1x4x8x8xbf16, #tpu.memory_space<vmem>>, %arg6: memref<1x4x8x8xbf16, #tpu.memory_space<vmem>>) attributes {dimension_semantics = [#tpu.dimension_semantics<parallel>], iteration_bounds = array<i64: 2>, scalar_prefetch = 0 : i64, scratch_operands = 0 : i64, tpu.core_type = #tpu.core_type<tc>, window_params = [{transform_indices = @transform_0, window_bounds = array<i64: 1, 8, 32>}, {transform_indices = @transform_1, window_bounds = array<i64: 1, 8, 32>}, {pipeline_mode = #tpu.pipeline_mode<synchronous>, transform_indices = @transform_2, window_bounds = array<i64: 32, 32>}, {pipeline_mode = #tpu.pipeline_mode<synchronous>, transform_indices = @transform_3, window_bounds = array<i64: 32, 32>}, {transform_indices = @transform_4, window_bounds = array<i64: 1, 4, 8, 8>}, {transform_indices = @transform_5, window_bounds = array<i64: 1, 4, 8, 8>}]} {
    %c0 = arith.constant 0 : index
    %c0_0 = arith.constant 0 : index
    %0 = vector.load %arg3[%c0, %c0_0] : memref<32x32xbf16, #tpu.memory_space<vmem>>, vector<32x32xbf16>
    %c0_1 = arith.constant 0 : index
    %c0_2 = arith.constant 0 : index
    %c0_3 = arith.constant 0 : index
    %1 = vector.load %arg1[%c0_1, %c0_2, %c0_3] : memref<1x8x32xbf16, #tpu.memory_space<vmem>>, vector<1x8x32xbf16>
    %2 = vector.shape_cast %1 : vector<1x8x32xbf16> to vector<8x32xbf16>
    "tpu.trace_start"() <{level = 10 : i32, message = "of,kf->ok"}> : () -> ()
    %cst = arith.constant dense<0.000000e+00> : vector<32x8xf32>
    %3 = tpu.matmul %0, %2, %cst {dimension_numbers = #tpu.dot_dimension_numbers<[1], [1], [0], [0], [0, 0, 1, 0], [], []>} : vector<32x32xbf16>, vector<8x32xbf16>, vector<32x8xf32> -> vector<32x8xf32>
    "tpu.trace_stop"() : () -> ()
    %4 = vector.shape_cast %3 : vector<32x8xf32> to vector<4x8x8xf32>
    %5 = arith.truncf %4 : vector<4x8x8xf32> to vector<4x8x8xbf16>
    %c0_4 = arith.constant 0 : index
    %c0_5 = arith.constant 0 : index
    %c0_6 = arith.constant 0 : index
    %c0_7 = arith.constant 0 : index
    %6 = vector.load %arg5[%c0_4, %c0_5, %c0_6, %c0_7] : memref<1x4x8x8xbf16, #tpu.memory_space<vmem>>, vector<1x4x8x8xbf16>
    %7 = vector.shape_cast %6 : vector<1x4x8x8xbf16> to vector<4x8x8xbf16>
    %8 = vector.shape_cast %5 : vector<4x8x8xbf16> to vector<1x4x8x8xbf16>
    tpu.vector_store %arg5[%c0_4, %c0_5, %c0_6, %c0_7], %8 {strides = array<i32>} : memref<1x4x8x8xbf16, #tpu.memory_space<vmem>>, vector<1x4x8x8xbf16>,
    %c0_8 = arith.constant 0 : index
    %c0_9 = arith.constant 0 : index
    %c0_10 = arith.constant 0 : index
    %9 = vector.load %arg2[%c0_8, %c0_9, %c0_10] : memref<1x8x32xbf16, #tpu.memory_space<vmem>>, vector<1x8x32xbf16>
    %10 = vector.shape_cast %9 : vector<1x8x32xbf16> to vector<8x32xbf16>
    %c0_11 = arith.constant 0 : index
    %c0_12 = arith.constant 0 : index
    %11 = vector.load %arg4[%c0_11, %c0_12] : memref<32x32xbf16, #tpu.memory_space<vmem>>, vector<32x32xbf16>
    %cst_13 = arith.constant dense<0.000000e+00> : vector<8x32xf32>
    %12 = tpu.matmul %10, %11, %cst_13 {dimension_numbers = #tpu.dot_dimension_numbers<[1], [0], [0], [1], [0, 0, 1, 1], [], []>} : vector<8x32xbf16>, vector<32x32xbf16>, vector<8x32xf32> -> vector<8x32xf32>
    %13 = vector.shape_cast %12 : vector<8x32xf32> to vector<8x4x8xf32>
    %14 = tpu.transpose %13, [1, 0, 2] : vector<8x4x8xf32> -> vector<4x8x8xf32>
    %15 = arith.truncf %14 : vector<4x8x8xf32> to vector<4x8x8xbf16>
    %c0_14 = arith.constant 0 : index
    %c0_15 = arith.constant 0 : index
    %c0_16 = arith.constant 0 : index
    %c0_17 = arith.constant 0 : index
    %16 = vector.load %arg6[%c0_14, %c0_15, %c0_16, %c0_17] : memref<1x4x8x8xbf16, #tpu.memory_space<vmem>>, vector<1x4x8x8xbf16>
    %17 = vector.shape_cast %16 : vector<1x4x8x8xbf16> to vector<4x8x8xbf16>
    %18 = vector.shape_cast %15 : vector<4x8x8xbf16> to vector<1x4x8x8xbf16>
    tpu.vector_store %arg6[%c0_14, %c0_15, %c0_16, %c0_17], %18 {strides = array<i32>} : memref<1x4x8x8xbf16, #tpu.memory_space<vmem>>, vector<1x4x8x8xbf16>,
    return
  }
  func.func @transform_0(%arg0: i32) -> (i32, i32, i32) {
    %c0_i32 = arith.constant 0 : i32
    %c0_i32_0 = arith.constant 0 : i32
    %c0_i32_1 = arith.constant 0 : i32
    return %arg0, %c0_i32, %c0_i32_0 : i32, i32, i32
  }
  func.func @transform_1(%arg0: i32) -> (i32, i32, i32) {
    %c0_i32 = arith.constant 0 : i32
    %c0_i32_0 = arith.constant 0 : i32
    %c0_i32_1 = arith.constant 0 : i32
    return %arg0, %c0_i32, %c0_i32_0 : i32, i32, i32
  }
  func.func @transform_2(%arg0: i32) -> (i32, i32) {
    %c0_i32 = arith.constant 0 : i32
    %c0_i32_0 = arith.constant 0 : i32
    %c0_i32_1 = arith.constant 0 : i32
    return %c0_i32, %c0_i32_0 : i32, i32
  }
  func.func @transform_3(%arg0: i32) -> (i32, i32) {
    %c0_i32 = arith.constant 0 : i32
    %c0_i32_0 = arith.constant 0 : i32
    %c0_i32_1 = arith.constant 0 : i32
    return %c0_i32, %c0_i32_0 : i32, i32
  }
  func.func @transform_4(%arg0: i32) -> (i32, i32, i32, i32) {
    %c0_i32 = arith.constant 0 : i32
    %c0_i32_0 = arith.constant 0 : i32
    %c0_i32_1 = arith.constant 0 : i32
    %c0_i32_2 = arith.constant 0 : i32
    return %arg0, %c0_i32, %c0_i32_0, %c0_i32_1 : i32, i32, i32, i32
  }
  func.func @transform_5(%arg0: i32) -> (i32, i32, i32, i32) {
    %c0_i32 = arith.constant 0 : i32
    %c0_i32_0 = arith.constant 0 : i32
    %c0_i32_1 = arith.constant 0 : i32
    %c0_i32_2 = arith.constant 0 : i32
    return %arg0, %c0_i32, %c0_i32_0, %c0_i32_1 : i32, i32, i32, i32
  }
}

</mosaic_0001>

<bundles_post_ra>
// kernel: tpu_custom_call.1
= control target key start
LH: loop header
LB: loop body
LE: loop exit
PB: predicated region body
PF: predicated region fallthrough
CT: control target
= control target key end

     0   :  { %s1496_s0 = inlined_call_operand.hbm [shape: bf16[2,8,32], index: 0, kind: input, shape index: {}]   ;;  %s1497_s1 = inlined_call_operand.hbm [shape: bf16[2,8,32], index: 1, kind: input, shape index: {}]   ;;  %s1498_s2 = inlined_call_operand.hbm [shape: bf16[32,32], index: 2, kind: input, shape index: {}]   ;;  %s1499_s3 = inlined_call_operand.hbm [shape: bf16[32,32], index: 3, kind: input, shape index: {}]   ;;  %s1500_s4 = inlined_call_operand.hbm [shape: bf16[2,4,8,8], index: 4, kind: output, shape index: {0}]   ;;  %s1501_s5 = inlined_call_operand.hbm [shape: bf16[2,4,8,8], index: 5, kind: output, shape index: {1}]  }
   0x1   :  { %1506 = sst [smem:[#allocation19_spill]] %s1498_s2 }
   0x2   :  { %1507 = sst [smem:[#allocation20_spill]] %s1499_s3 }
   0x3   :  { %11 = vsyncpa [#allocation3], 0 }
   0x4   :  { %13 = vsyncpa [#allocation3 + $0x1], 0 }
   0x5   :  { %14 = vsyncpa [#allocation6], 0 }
   0x6   :  { %16 = vsyncpa [#allocation6 + $0x1], 0 }
   0x7   :  { %17 = vsyncpa [#allocation9], 0 }
   0x8   :  { %18 = vsyncpa [#allocation4], 0 }
   0x9   :  { %20 = vsyncpa [#allocation4 + $0x1], 0 }
   0xa   :  { %21 = vsyncpa [#allocation12], 0 }
   0xb   :  { %23 = vsyncpa [#allocation12 + $0x1], 0  ;;  %s1208_s18 = smov 0   ;;  %s1210_s19 = smov 0  }
   0xc   :  { %s1212_s20 = smov 0   ;;  %s1214_s21 = smov 0  }
   0xd LB: > { %s1229_s22 = sadd.s32 4294967295, %s1159_s21   ;;  %s797_s23 = sadd.s32 4294967294, %s1159_s21   ;;  %s1159_s21 = sphi %s1214_s21, %s1529_s21   ;;  %s1155_s20 = sphi %s1212_s20, %s1528_s20   ;;  %s1151_s19 = sphi %s1210_s19, %s1527_s19   ;;  %s1147_s18 = sphi %s1208_s18, %s1526_s18  }
   0xe   : > { %p49_p0 = scmp.ne.s32.totalorder %s1151_s19, %s1147_s18  ;;  %p1502_p1 = scmp.eq.s32.totalorder %s1229_s22, 0 }
   0xf   : > { %p147_p3 = scmp.eq.s32.totalorder %s797_s23, 1  ;;  %p798_p5 = scmp.ge.s32.totalorder %s1159_s21, 1 }
  0x10   : > { %p1238_p4 = por %p1502_p1, %p49_p0  ;;  %p180_p7 = scmp.lt.s32.totalorder %s1159_s21, 3 }
  0x11   : > { %p1243_p6 = por %p147_p3, %p49_p0  ;;  %s1161_s27 = smov [#allocation7]  }
  0x12   : > { %s1508_s24 = scalar_select %p1238_p4, 1, 0 }
  0x13   : > { %s1509_s25 = scalar_select %p1243_p6, 1, 0 }
  0x14   : > { %p1248_p8 = pnand %p798_p5, %p180_p7  ;;  %s192_s28 = sshll.u32 %s1161_s27, 4  ;;  %s193_s28 = int_to_ptr.vmem [resolvable:$true] %s192_s28 }
  0x15   : > { %s1162_s30 = smov [#allocation8]   ;;  %s956_s7 = scalar_lea.vmem %s193_s28, 256 }
  0x16   : > { %s1510_s26 = scalar_select %p1248_p8, 1, 0 }
  0x17   : > { %p869_p9 = pneg %p1248_p8  ;;  %s205_s6 = sshll.u32 %s1162_s30, 4  ;;  %s206_s6 = int_to_ptr.vmem [resolvable:$true] %s205_s6 }
  0x18   : > { %p957_p13 = scmp.ne.s32.totalorder %s193_s28, %s956_s7  ;;  %p964_p5 = scmp.lt.s32.totalorder %s193_s28, %s193_s28 }
  0x19   : > { %p1257_p11 = pnand %p869_p9, %p1502_p1  ;;  %p965_p7 = scmp.lt.s32.totalorder %s956_s7, %s956_s7 }
  0x1b   : > { %p947_p12 = pneg %p1257_p11  ;;  %p966_p10 = por %p965_p7, %p964_p5 }
  0x1d   : > { %p959_p0 = pnand %p957_p13, %p947_p12 }
  0x1f   : > { %p960_p3 = pneg %p959_p0 }
  0x21   : > { %p967_p9 = pnand %p966_p10, %p960_p3 }
  0x23   : > { %970 = shalt.err (!%p967_p9)
}
  0x24   : > { %s1163_s8 = smov 64   ;;  %s1164_s9 = smov 4  }
  0x25   : > { %s1512_s2 = sld [smem:[#allocation19_spill]]  ;;  %s982_s12 = scalar_lea.vmem %s206_s6, 256 }
  0x26   : > { %p983_p1 = scmp.ne.s32.totalorder %s206_s6, %s982_s12  ;;  %p990_p2 = scmp.lt.s32.totalorder %s206_s6, %s206_s6 }
  0x27   : > { %p991_p6 = scmp.lt.s32.totalorder %s982_s12, %s982_s12 }
  0x28   : > { %p985_p13 = pnand %p983_p1, %p947_p12 }
  0x29   : > { %p992_p5 = por %p991_p6, %p990_p2 }
  0x2a   : > { %p986_p0 = pneg %p985_p13 }
  0x2b   : > { %872 = dma.hbm_to_vmem [thread:$0]  (!%p1257_p11), %s1512_s2, 256, %s193_s28, [#allocation6], %s1163_s8, %s1163_s8, %s1164_s9  }
  0x2c   : > { %p993_p10 = pnand %p992_p5, %p986_p0 }
  0x2e   : > { %996 = shalt.err (!%p993_p10)
}
  0x2f   : > { %s1513_s3 = sld [smem:[#allocation20_spill]]  ;;  %s1280_s15 = sadd.s32 1, %s1159_s21  }
  0x30   : > { %s36_s16 = sadd.s32 1, %s1155_s20  ;;  %s33_s17 = ssub.s32 %s1159_s21, %s1280_s15 }
  0x31   : > { %p43_p1 = scmp.ne.s32.totalorder %s1155_s20, %s1151_s19  ;;  %p34_p2 = scmp.eq.s32.totalorder %s33_s17, 0 }
  0x32   : > { %p44_p6 = scmp.eq.s32.totalorder %s1159_s21, 0  ;;  %p1514_p12 = scmp.eq.s32.totalorder %s1229_s22, 1 }
  0x33   : > { %p892_p7 = scmp.lt.s32.totalorder %s1159_s21, 2  ;;  %s219_s28 = sand.u32 1, %s1155_s20  }
  0x34   : > { %p1290_p3 = por %p1514_p12, %p43_p1  ;;  %p45_p9 = por %p44_p6, %p43_p1 }
  0x35   : > { %875 = dma.hbm_to_vmem [thread:$0]  (!%p1257_p11), %s1513_s3, 256, %s206_s6, [#allocation9], %s1163_s8, %s1163_s8, %s1164_s9  }
  0x36   : > { %s1515_s23 = scalar_select %p1290_p3, 1, 0 }
  0x37   : > { %s1296_s27 = scalar_select %p34_p2, %s1155_s20, %s36_s16  }
  0x38   : > { %s1299_s29 = sshll.u32 %s219_s28, 2  ;;  %s803_s30 = sshll.u32 %s1159_s21, 6 }
  0x39   : > { %s1305_s8 = scalar_lea.hbm %s1496_s0, %s803_s30  ;;  %s223_s9 = scalar_lea.vmem [#allocation2], %s1299_s29 }
  0x3a   : > { %s230_s10 = sshll.u32 %s223_s9, 4  ;;  %p1310_p11 = pnand %p892_p7, %p45_p9  ;;  %s1308_s10 = int_to_ptr.vmem [resolvable:$true] %s230_s10 }
  0x3b   : > { %s1317_s14 = scalar_lea.hbm %s1497_s1, %s803_s30  ;;  %s237_s16 = sand.u32 1, %s1159_s21  }
  0x3c   : > { %s220_s17 = scalar_lea.sflag [#allocation3], %s219_s28  ;;  %s997_s6 = scalar_lea.hbm %s1305_s8, 64 }
  0x3d   : > { %p998_p13 = scmp.ne.s32.totalorder %s1305_s8, %s997_s6  ;;  %p999_p0 = pneg %p1310_p11 }
  0x3e   : > { %s1002_s2 = scalar_lea.hbm %s1496_s0, 128  ;;  %p1003_p1 = scmp.lt.s32.totalorder %s1305_s8, %s1496_s0 }
  0x3f   : > { %p1000_p5 = pnand %p999_p0, %p998_p13  ;;  %p1004_p2 = scmp.lt.s32.totalorder %s1002_s2, %s997_s6 }
  0x41   : > { %p1001_p10 = pneg %p1000_p5  ;;  %p1005_p6 = por %p1004_p2, %p1003_p1 }
  0x43   : > { %p1006_p12 = pnand %p1005_p6, %p1001_p10 }
  0x45   : > { %1009 = shalt.err (!%p1006_p12)
}
  0x46   : > { %s1010_s28 = scalar_lea.vmem %s1308_s10, 64  ;;  %s1165_s30 = smov [#allocation2]  }
  0x47   : > { %p1011_p7 = scmp.ne.s32.totalorder %s1308_s10, %s1010_s28  ;;  %s1015_s13 = sshll.u32 %s1165_s30, 4  ;;  %s1016_s13 = int_to_ptr.vmem [resolvable:$false] %s1015_s13 }
  0x48   : > { %s1017_s7 = scalar_lea.vmem %s1016_s13, 128  ;;  %p1018_p5 = scmp.lt.s32.totalorder %s1308_s10, %s1016_s13 }
  0x49   : > { %p1013_p9 = pnand %p1011_p7, %p999_p0  ;;  %p1019_p3 = scmp.lt.s32.totalorder %s1017_s7, %s1010_s28 }
  0x4b   : > { %p1014_p13 = pneg %p1013_p9  ;;  %p1020_p4 = por %p1019_p3, %p1018_p5 }
  0x4d   : > { %p1021_p1 = pnand %p1020_p4, %p1014_p13 }
  0x4f   : > { %1024 = shalt.err (!%p1021_p1)
}
  0x50   : > { %879 = dma.hbm_to_vmem [thread:$0]  (!%p1310_p11), %s1305_s8, 64, %s1308_s10, %s220_s17  }
  0x51   : > { %s241_s2 = scalar_lea.vmem [#allocation5], %s1299_s29  ;;  %s238_s6 = scalar_lea.sflag [#allocation6], %s237_s16 }
  0x52   : > { %s248_s3 = sshll.u32 %s241_s2, 4  ;;  %s1025_s9 = scalar_lea.hbm %s1317_s14, 64  ;;  %s249_s3 = int_to_ptr.vmem [resolvable:$true] %s248_s3 }
  0x53   : > { %p1026_p3 = scmp.ne.s32.totalorder %s1317_s14, %s1025_s9  ;;  %s1030_s30 = scalar_lea.hbm %s1497_s1, 128 }
  0x54   : > { %p1031_p2 = scmp.lt.s32.totalorder %s1317_s14, %s1497_s1  ;;  %p1032_p6 = scmp.lt.s32.totalorder %s1030_s30, %s1025_s9 }
  0x55   : > { %p1028_p4 = pnand %p1026_p3, %p999_p0 }
  0x56   : > { %p1033_p12 = por %p1032_p6, %p1031_p2 }
  0x57   : > { %p1029_p10 = pneg %p1028_p4 }
  0x59   : > { %p1034_p7 = pnand %p1033_p12, %p1029_p10 }
  0x5b   : > { %1037 = shalt.err (!%p1034_p7)
}
  0x5c   : > { %s1038_s29 = scalar_lea.vmem %s249_s3, 64  ;;  %s1166_s8 = smov [#allocation5]  }
  0x5d   : > { %p1039_p9 = scmp.ne.s32.totalorder %s249_s3, %s1038_s29  ;;  %s1043_s10 = sshll.u32 %s1166_s8, 4  ;;  %s1044_s10 = int_to_ptr.vmem [resolvable:$false] %s1043_s10 }
  0x5e   : > { %s1045_s16 = scalar_lea.vmem %s1044_s10, 128  ;;  %p1046_p1 = scmp.lt.s32.totalorder %s249_s3, %s1044_s10 }
  0x5f   : > { %p1041_p13 = pnand %p1039_p9, %p999_p0  ;;  %p1047_p3 = scmp.lt.s32.totalorder %s1045_s16, %s1038_s29 }
  0x61   : > { %p1042_p5 = pneg %p1041_p13  ;;  %p1048_p4 = por %p1047_p3, %p1046_p1 }
  0x63   : > { %p1049_p8 = pnand %p1048_p4, %p1042_p5 }
  0x65   : > { %1052 = shalt.err (!%p1049_p8)
}
  0x66   : > { %882 = dma.hbm_to_vmem [thread:$0]  (!%p1310_p11), %s1317_s14, 64, %s249_s3, %s238_s6  }
  0x67   : > { %p1517_p10 = scmp.ne.s32.totalorder %s1510_s26, 0 }
  0x68   : > { %s1368_s17 = sand.u32 (!%p1517_p10), 1, %s1151_s19   ;;  %p1518_p0 = scmp.ne.s32.totalorder (!%p1517_p10), %s1508_s24, 0 }
  0x69   : > { %257 = sbr.rel (%p1517_p10) target bundleno = 475 (0x1db), region = 36  ;;  %s807_s2 = sshll.u32 (!%p1517_p10), %s1368_s17, 2 }
  0x6a   : > { %s260_s9 = scalar_lea.sflag (!%p1517_p10), [#allocation3], %s1368_s17  ;;  %s263_s12 = scalar_lea.vmem (!%p1517_p10), [#allocation2], %s807_s2 }
  0x6e   : > { %1122 = dma.done.wait (%p1518_p0), %s260_s9, 64  }
  0x6f   : > { %1124 = vsyncadd (%p1518_p0), %s260_s9, 4294967232  ;;  %s268_s11 = sand.u32 1, %s1229_s22   ;;  %s272_s26 = scalar_lea.vmem [#allocation5], %s807_s2 }
  0x70   : > { %s269_s14 = scalar_lea.sflag [#allocation6], %s268_s11 }
  0x71   : > { %1126 = dma.done.wait (%p1518_p0), %s269_s14, 64  }
  0x72   : > { %1128 = vsyncadd (%p1518_p0), %s269_s14, 4294967232  ;;  %p1519_p8 = scmp.eq.s32.totalorder %s1229_s22, 0 }
  0x74   : > { %1130 = dma.done.wait (%p1519_p8), [#allocation6], 256   ;;  %p1520_p11 = pmov %p1519_p8 }
  0x75   : > { %p1521_p2 = pmov %p1519_p8 }
  0x76   : > { %1132 = vsyncadd (%p1520_p11), [#allocation6], 4294967040 }
  0x77   : > { %1134 = dma.done.wait (%p1521_p2), [#allocation9], 256   ;;  %p1522_p6 = pmov %p1521_p2 }
  0x78   : > { %v1167_v0 = vmov 0.0   ;;  %vm1168_vm0 = vmmov 0   ;;  %v941_v1 = vld [vmem:[#allocation8 + $0x8] sm:$0xff]   ;;  %v942_v2 = vld [vmem:[#allocation8] sm:$0xff]   ;;  %vm333_vm1 = vcmask 261120   ;;  %v943_v5 = vld [vmem:[#allocation7] sm:$0xff]  }
  0x79   : > { %1136 = vsyncadd (%p1522_p6), [#allocation9], 4294967040  ;;  %844 = vmatprep.subr.bf16.mxu1 %v1167_v0  ;;  %848 = vmatprep.mubr.msk.bf16.mxu1 %vm1168_vm0, %v1167_v0  ;;  %v322_v3 = vld [vmem:[%s263_s12] sm:$0xf]  ;;  %v401_v6 = vld [vmem:[%s272_s26] sm:$0xf] }
  0x7a   : > { %845 = vmatpush3.bf16.msra.mxu1 %v941_v1  ;;  %852 = vmatprep.subr.msk.bf16.mxu0 %vm333_vm1, %v322_v3  ;;  %v341_v4 = vsel %vm333_vm1, %v322_v3, 0  ;;  %v944_v7 = vld [vmem:[#allocation7 + $0x8] sm:$0xff]   ;;  %s1169_s24 = smov 104   ;;  %s1170_s3 = smov 120   ;;  %vm396_vm2 = vcmask 60416  }
  0x7b   : > { %846 = vmatprep.subr.bf16.mxu1 %v1167_v0  ;;  %839 = vmatpush3.bf16.xpose.msra.mxu0 %v341_v4  ;;  %s811_s6 = sshll.u32 %s1368_s17, 4  ;;  %s1171_s28 = smov 112  }
  0x7c   : > { %840 = vmatprep.mubr.msk.bf16.mxu0 %vm333_vm1, %v943_v5  ;;  %s309_s30 = scalar_lea.vmem [#allocation10], %s811_s6  ;;  %s830_s7 = sshll.u32 %s1229_s22, 8 }
  0x7d   : > { %s634_s13 = sshll.u32 %s309_s30, 4  ;;  %s1409_s10 = scalar_lea.hbm %s1500_s4, %s830_s7  ;;  %s1401_s13 = int_to_ptr.vmem [resolvable:$true] %s634_s13 }
  0x7e   : > { %847 = vmatpush3.bf16.msra.mxu1 %v942_v2  ;;  %s616_s16 = scalar_lea.sflag [#allocation4], %s1368_s17  ;;  %s1053_s2 = scalar_lea.vmem %s1401_s13, 256 }
  0x7f   : > { %p1054_p12 = scmp.ne.s32.totalorder %s1401_s13, %s1053_s2  ;;  %p1523_p7 = scmp.ne.s32.totalorder %s1515_s23, 0 }
  0x80   : > { %s1172_s9 = smov [#allocation10]  }
  0x81   : > { %849 = vmatmul.mubr.msk.bf16.vlgmr.msra.gmra.mxu1 %vm333_vm1, %v401_v6  ;;  %p1055_p9 = pnand %p1054_p12, %p1523_p7  ;;  %s1057_s12 = sshll.u32 %s1172_s9, 4  ;;  %s1058_s12 = int_to_ptr.vmem [resolvable:$false] %s1057_s12 }
  0x82   : > { %841 = vmatmul.mubr.msk.bf16.vlgmr.msra.gmra.mxu0 %vm333_vm1, %v944_v7  ;;  %s1059_s11 = scalar_lea.vmem %s1058_s12, 512  ;;  %p1060_p5 = scmp.lt.s32.totalorder %s1401_s13, %s1058_s12 }
  0x83   : > { %p1056_p13 = pneg %p1055_p9  ;;  %p1061_p1 = scmp.lt.s32.totalorder %s1059_s11, %s1053_s2 }
  0x85   : > { %p1062_p3 = por %p1061_p1, %p1060_p5 }
  0x87   : > { %p1063_p4 = pnand %p1062_p3, %p1056_p13 }
 0x141   : > { %v1389_v8 = vpop.f32.mrf.mxu1 }
 0x142   : > { %468 = vrot.lane.b32.xlu1 %v1389_v8, %s1169_s24  ;;  %462 = vrot.lane.b32.xlu0 %v1389_v8, %s1170_s3  ;;  %v842_v10 = vpop.f32.mrf.mxu0 }
 0x143   : > { %v850_v9 = vpop.f32.mrf.mxu1  ;;  %v394_v12 = vpack.c.bf16 %v842_v10, %v842_v10 }
 0x144   : > { %v377_v13 = vpop.f32.mrf.mxu0 }
 0x145   : > { %v458_v11 = vpop.f32.mrf.mxu1  ;;  %v392_v14 = vpack.c.bf16 %v377_v13, %v377_v13  ;;  %399 = vst.msk [vmem:[%s309_s30 + $0x8] sm:$0xf] %vm396_vm2, %v394_v12 }
 0x146   : > { %465 = vrot.lane.b32.xlu0 %v1389_v8, %s1171_s28  ;;  %v843_v16 = vpop.f32.mrf.mxu0 }
 0x147   : > { %v851_v15 = vpop.f32.mrf.mxu1  ;;  %397 = vst.msk [vmem:[%s309_s30] sm:$0xf] %vm396_vm2, %v392_v14  ;;  %v395_v17 = vpack.c.bf16 %v843_v16, %v843_v16 }
 0x148   : > { %v380_v18 = vpop.f32.mrf.mxu0 }
 0x149   : > { %400 = vst.msk [vmem:[%s309_s30 + $0xc] sm:$0xf] %vm396_vm2, %v395_v17  ;;  %v393_v19 = vpack.c.bf16 %v380_v18, %v380_v18 }
 0x14b   : > { %398 = vst.msk [vmem:[%s309_s30 + $0x4] sm:$0xf] %vm396_vm2, %v393_v19 }
 0x14c   : > { %1066 = shalt.err (!%p1063_p4)
}
 0x14d   : > { %s1067_s14 = scalar_lea.hbm %s1409_s10, 256  ;;  %s1071_s3 = scalar_lea.hbm %s1500_s4, 512 }
 0x14e   : > { %p1068_p10 = scmp.ne.s32.totalorder %s1409_s10, %s1067_s14  ;;  %p1072_p11 = scmp.lt.s32.totalorder %s1409_s10, %s1500_s4 }
 0x14f   : > { %p1073_p2 = scmp.lt.s32.totalorder %s1071_s3, %s1067_s14 }
 0x150   : > { %p1069_p0 = pnand %p1068_p10, %p1523_p7 }
 0x151   : > { %p1074_p6 = por %p1073_p2, %p1072_p11 }
 0x152   : > { %p1070_p8 = pneg %p1069_p0 }
 0x154   : > { %p1075_p12 = pnand %p1074_p6, %p1070_p8 }
 0x156   : > { %1078 = shalt.err (!%p1075_p12)
}
 0x157   : > { %s1173_s29 = smov 64   ;;  %s1174_s8 = smov 4   ;;  %v1175_v20 = vmov 1983009808   ;;  %v476_v22 = vlaneseq  ;;  %v1176_v23 = vmov 1934713408  }
 0x158   : > { %865 = dma.vmem_to_hbm [thread:$0]  (%p1523_p7), %s1401_s13, 256, %s1409_s10, %s616_s16, %s1173_s29, %s1173_s29, %s1174_s8   ;;  %v474_v21 = vunpack.c.l.s4 %v1175_v20  ;;  %v506_v24 = vunpack.c.l.s4 %v1176_v23 }
 0x159   : > { %v477_v26 = vshrl.u32 %v476_v22, 7  ;;  %s316_s13 = scalar_lea.vmem [#allocation11], %s811_s6  ;;  %s1448_s6 = scalar_lea.hbm %s1501_s5, %s830_s7 }
 0x15a   : > { %v475_v25 = vunpack.c.0.s8 %v474_v21  ;;  %v507_v29 = vunpack.c.0.s8 %v506_v24  ;;  %s650_s10 = sshll.u32 %s316_s13, 4  ;;  %s621_s9 = scalar_lea.sflag [#allocation12], %s1368_s17  ;;  %s1441_s10 = int_to_ptr.vmem [resolvable:$true] %s650_s10 }
 0x15b   : > { %s1079_s12 = scalar_lea.vmem %s1441_s10, 256  ;;  %s1177_s22 = smov [#allocation11]  }
 0x15c   : > { %v478_v30 = vsub.s32 %v475_v25, %v477_v26  ;;  %v510_v36 = vsub.s32 %v507_v29, %v477_v26  ;;  %p1080_p9 = scmp.ne.s32.totalorder %s1441_s10, %s1079_s12  ;;  %s1083_s11 = sshll.u32 %s1177_s22, 4  ;;  %s1084_s11 = int_to_ptr.vmem [resolvable:$false] %s1083_s11 }
 0x15d   : > { %s1085_s14 = scalar_lea.vmem %s1084_s11, 512  ;;  %p1086_p1 = scmp.lt.s32.totalorder %s1441_s10, %s1084_s11 }
 0x15e   : > { %p1081_p13 = pnand %p1080_p9, %p1523_p7  ;;  %p1087_p3 = scmp.lt.s32.totalorder %s1085_s14, %s1079_s12 }
 0x160   : > { %p1082_p5 = pneg %p1081_p13  ;;  %p1088_p4 = por %p1087_p3, %p1086_p1 }
 0x162   : > { %p1089_p10 = pnand %p1088_p4, %p1082_p5 }
 0x1b4   : > { %v469_v27 = vpop.permute.xlu1 %468  ;;  %v463_v28 = vpop.permute.xlu0 %462 }
 0x1b5   : > { %v487_v31 = vcombine.low %v463_v28, %v469_v27  ;;  %v488_v32 = vcombine.high %v463_v28, %v469_v27 }
 0x1b7   : > { %v495_v37 = vrot.slane %v487_v31, %v478_v30  ;;  %v502_v38 = vrot.slane %v488_v32, %v478_v30 }
 0x1b8   : > { %v466_v33 = vpop.permute.xlu0 %465 }
 0x1b9   : > { %v471_v34 = vcombine.low %v1389_v8, %v466_v33  ;;  %v472_v35 = vcombine.high %v1389_v8, %v466_v33 }
 0x1bb   : > { %v479_v39 = vrot.slane %v471_v34, %v478_v30  ;;  %v486_v40 = vrot.slane %v472_v35, %v478_v30 }
 0x1bd   : > { %v503_v41 = vcombine.low %v479_v39, %v495_v37  ;;  %v504_v42 = vcombine.high %v479_v39, %v495_v37  ;;  %v519_v43 = vcombine.low %v486_v40, %v502_v38  ;;  %v520_v44 = vcombine.high %v486_v40, %v502_v38 }
 0x1bf   : > { %v511_v45 = vrot.slane %v503_v41, %v510_v36  ;;  %v518_v46 = vrot.slane %v504_v42, %v510_v36  ;;  %v527_v47 = vrot.slane %v519_v43, %v510_v36  ;;  %v534_v48 = vrot.slane %v520_v44, %v510_v36 }
 0x1c1   : > { %v539_v49 = vcombine.low %v511_v45, %v518_v46  ;;  %v820_v50 = vcombine.high %v511_v45, %v518_v46  ;;  %v555_v51 = vcombine.low %v527_v47, %v534_v48  ;;  %v821_v52 = vcombine.high %v527_v47, %v534_v48 }
 0x1c3   : > { %v546_v53 = vrot.slane %v539_v49, %v478_v30  ;;  %v554_v54 = vrot.slane %v820_v50, %v478_v30  ;;  %v562_v55 = vrot.slane %v555_v51, %v478_v30  ;;  %v570_v56 = vrot.slane %v821_v52, %v478_v30 }
 0x1c5   : > { %v571_v57 = vcombine.low %v546_v53, %v554_v54  ;;  %v572_v58 = vcombine.high %v546_v53, %v554_v54  ;;  %v587_v59 = vcombine.low %v562_v55, %v570_v56  ;;  %v588_v60 = vcombine.high %v562_v55, %v570_v56 }
 0x1c7   : > { %v579_v61 = vrot.slane %v571_v57, %v510_v36  ;;  %v586_v62 = vrot.slane %v572_v58, %v510_v36  ;;  %v595_v63 = vrot.slane %v587_v59, %v510_v36  ;;  %v602_v0 = vrot.slane %v588_v60, %v510_v36 }
 0x1c9   : > { %v603_v1 = vcombine.low %v579_v61, %v595_v63  ;;  %v604_v2 = vcombine.high %v579_v61, %v595_v63  ;;  %v605_v3 = vcombine.low %v586_v62, %v602_v0  ;;  %v606_v4 = vcombine.high %v586_v62, %v602_v0 }
 0x1cb   : > { %v607_v5 = vpack.c.bf16 %v603_v1, %v603_v1  ;;  %v608_v6 = vpack.c.bf16 %v604_v2, %v604_v2  ;;  %v609_v7 = vpack.c.bf16 %v605_v3, %v605_v3  ;;  %v610_v8 = vpack.c.bf16 %v606_v4, %v606_v4 }
 0x1cd   : > { %611 = vst.msk [vmem:[%s316_s13] sm:$0xf] %vm396_vm2, %v607_v5  ;;  %612 = vst.msk [vmem:[%s316_s13 + $0x4] sm:$0xf] %vm396_vm2, %v608_v6 }
 0x1ce   : > { %613 = vst.msk [vmem:[%s316_s13 + $0x8] sm:$0xf] %vm396_vm2, %v609_v7  ;;  %614 = vst.msk [vmem:[%s316_s13 + $0xc] sm:$0xf] %vm396_vm2, %v610_v8 }
 0x1cf   : > { %1092 = shalt.err (!%p1089_p10)
}
 0x1d0   : > { %s1093_s7 = scalar_lea.hbm %s1448_s6, 256  ;;  %s1097_s24 = scalar_lea.hbm %s1501_s5, 512 }
 0x1d1   : > { %p1094_p0 = scmp.ne.s32.totalorder %s1448_s6, %s1093_s7  ;;  %p1098_p2 = scmp.lt.s32.totalorder %s1448_s6, %s1501_s5 }
 0x1d2   : > { %p1099_p6 = scmp.lt.s32.totalorder %s1097_s24, %s1093_s7 }
 0x1d3   : > { %p1095_p8 = pnand %p1094_p0, %p1523_p7 }
 0x1d4   : > { %p1100_p12 = por %p1099_p6, %p1098_p2 }
 0x1d5   : > { %p1096_p11 = pneg %p1095_p8 }
 0x1d7   : > { %p1101_p9 = pnand %p1100_p12, %p1096_p11 }
 0x1d9   : > { %1104 = shalt.err (!%p1101_p9)
}
 0x1da   : > { %866 = dma.vmem_to_hbm [thread:$0]  (%p1523_p7), %s1441_s10, 256, %s1448_s6, %s621_s9, %s1173_s29, %s1173_s29, %s1174_s8  }
 0x1db PF: > { %s665_s30 = sand.u32 1, %s1147_s18   ;;  %p1524_p13 = scmp.ne.s32.totalorder %s1509_s25, 0 }
 0x1dc   : > { %p1525_p5 = scmp.ge.s32.totalorder %s1159_s21, 2  ;;  %s666_s13 = scalar_lea.sflag [#allocation4], %s665_s30 }
 0x1de   : > { %p884_p1 = pnand %p1525_p5, %p1524_p13 }
 0x1e0   : > { %p885_p3 = pneg %p884_p1 }
 0x1e2   : > { %1138 = dma.done.wait (%p885_p3), %s666_s13, 256  }
 0x1e3   : > { %1140 = vsyncadd (%p885_p3), %s666_s13, 4294967040  ;;  %s675_s16 = scalar_lea.sflag [#allocation12], %s665_s30 }
 0x1e4   : > { %1142 = dma.done.wait (%p885_p3), %s675_s16, 256  }
 0x1e5   : > { %1144 = vsyncadd (%p885_p3), %s675_s16, 4294967040  ;;  %p26_p7 = scmp.ge.s32.totalorder %s1280_s15, 4   ;;  %s1526_s18 = smov %s1151_s19 }
 0x1e6   : > { %s1527_s19 = smov %s1155_s20  ;;  %s1528_s20 = smov %s1296_s27 }
 0x1e7   : > { %s1529_s21 = smov %s1280_s15  ;;  %28 = sbr.rel (!%p26_p7) target bundleno = 13 (0xd), region = 119 }
 0x1ec   :  { %680 = vsyncpa [#allocation3], 1 }
 0x1ed   :  { %682 = vsyncpa [#allocation3 + $0x1], 1 }
 0x1ee   :  { %683 = vsyncpa [#allocation6], 1 }
 0x1ef   :  { %685 = vsyncpa [#allocation6 + $0x1], 1 }
 0x1f0   :  { %686 = vsyncpa [#allocation9], 1 }
 0x1f1   :  { %687 = vsyncpa [#allocation4], 1 }
 0x1f2   :  { %689 = vsyncpa [#allocation4 + $0x1], 1 }
 0x1f3   :  { %690 = vsyncpa [#allocation12], 1 }
 0x1f4   :  { %692 = vsyncpa [#allocation12 + $0x1], 1 }

</bundles_post_ra>
